<compile_context>
chip_gen: v6e
topology: v6e:2x2x1
jax: 0.10.0
libtpu: 0.0.40
codegen_flags: <defaults>
</compile_context>

<pallas_src>
import functools

import jax
import jax.numpy as jnp
from jax.experimental import pallas as pl
from jax.experimental.pallas import tpu as pltpu


# ----------------------------------------------------------------------------
# Kernel: features-present path (gather + fused feature MLP + folded projection)
# ----------------------------------------------------------------------------
def item_embedding_kernel(ids_ref,        # SMEM (B_pad,) int32   (scalar prefetch)
                          feats_ref,      # VMEM (TB, F) f32
                          table_ref,      # HBM  (V, D_pad) f32   (pre-projected table)
                          w1_ref,         # VMEM (F, H) f32
                          b1_ref,         # VMEM (1, H) f32
                          w2p_ref,        # VMEM (H, D_pad) f32   (W2 @ Wp_feat)
                          b2p_ref,        # VMEM (1, D_pad) f32   (b2 @ Wp_feat + bp)
                          out_ref,        # VMEM (TB, D_pad) f32
                          gather_buf,     # VMEM scratch (TB, D_pad) f32
                          sems):          # DMA semaphores (TB,)
    tb = out_ref.shape[0]
    base = pl.program_id(0) * tb

    # 1) Launch all row-gather DMAs from the HBM-resident projected table.
    @pl.loop(0, tb)
    def _start(r):
        row = ids_ref[base + r]
        pltpu.make_async_copy(table_ref.at[pl.ds(row, 1), :],
                              gather_buf.at[pl.ds(r, 1), :],
                              sems.at[r]).start()

    # 2) Feature MLP (already fused with its half of the projection) — overlaps DMAs.
    h = jnp.dot(feats_ref[...], w1_ref[...],
                preferred_element_type=jnp.float32) + b1_ref[...]
    h = jnp.maximum(h, 0.0)
    feat_out = jnp.dot(h, w2p_ref[...],
                       preferred_element_type=jnp.float32) + b2p_ref[...]

    # 3) Wait on the row gathers, then add the id-path contribution.
    @pl.loop(0, tb)
    def _wait(r):
        pltpu.make_async_copy(table_ref.at[pl.ds(0, 1), :],
                              gather_buf.at[pl.ds(r, 1), :],
                              sems.at[r]).wait()

    out_ref[...] = gather_buf[...] + feat_out


# ----------------------------------------------------------------------------
# Kernel: features-absent path (gather of projected table + bias)
# ----------------------------------------------------------------------------
def item_embedding_ids_only_kernel(ids_ref,     # SMEM (B_pad,) int32
                                   table_ref,   # HBM  (V, D_pad) f32 (pre-projected)
                                   bias_ref,    # VMEM (1, D_pad) f32 (projection bias)
                                   out_ref,     # VMEM (TB, D_pad) f32
                                   gather_buf,  # VMEM scratch (TB, D_pad) f32
                                   sems):       # DMA semaphores (TB,)
    tb = out_ref.shape[0]
    base = pl.program_id(0) * tb

    @pl.loop(0, tb)
    def _start(r):
        row = ids_ref[base + r]
        pltpu.make_async_copy(table_ref.at[pl.ds(row, 1), :],
                              gather_buf.at[pl.ds(r, 1), :],
                              sems.at[r]).start()

    @pl.loop(0, tb)
    def _wait(r):
        pltpu.make_async_copy(table_ref.at[pl.ds(0, 1), :],
                              gather_buf.at[pl.ds(r, 1), :],
                              sems.at[r]).wait()

    out_ref[...] = gather_buf[...] + bias_ref[...]


# ----------------------------------------------------------------------------
# Host wrappers
# ----------------------------------------------------------------------------
def _pad_batch(x, b_pad):
    b = x.shape[0]
    if b == b_pad:
        return x
    pad = [(0, b_pad - b)] + [(0, 0)] * (x.ndim - 1)
    return jnp.pad(x, pad)


@functools.partial(jax.jit, static_argnames=("batch_tile",))
def item_embedding_forward(item_ids, table, item_features,
                           w1, b1, w2, b2, wp, bp, *, batch_tile=128):
    """Features-present path.
    item_ids: (B,) int; table: (V, D); item_features: (B, F).
    Linear weights already transposed to (in, out); wp: (2D, D)."""
    B = item_ids.shape[0]
    V, D = table.shape
    F = item_features.shape[1]
    H = w1.shape[1]

    # ---- host-side algebraic fold of the final projection ----
    wp_id, wp_feat = wp[:D, :], wp[D:, :]
    table_proj = table @ wp_id                       # (V, D); padding row stays 0
    w2_proj = w2 @ wp_feat                           # (H, D)
    b2_proj = b2 @ wp_feat + bp                      # (D,)

    # ---- lane-dense padding of the output feature dim (multiple of 128) ----
    D_pad = ((D + 127) // 128) * 128
    pad_d = D_pad - D
    table_proj = jnp.pad(table_proj, ((0, 0), (0, pad_d)))
    w2_proj = jnp.pad(w2_proj, ((0, 0), (0, pad_d)))
    b2_proj = jnp.pad(b2_proj, ((0, pad_d),)).reshape(1, D_pad)

    # ---- batch padding / tiling ----
    TB = min(batch_tile, ((B + 7) // 8) * 8)
    B_pad = ((B + TB - 1) // TB) * TB
    ids = jnp.clip(item_ids.astype(jnp.int32), 0, V - 1)   # guard OOB DMA
    ids = _pad_batch(ids, B_pad)                            # pad rows gather row 0
    feats = _pad_batch(item_features, B_pad)

    grid = (B_pad // TB,)
    grid_spec = pltpu.PrefetchScalarGridSpec(
        num_scalar_prefetch=1,
        grid=grid,
        in_specs=[
            pl.BlockSpec((TB, F), lambda i, ids_s: (i, 0)),      # features (tiled)
            pl.BlockSpec(memory_space=pl.ANY),                   # projected table (HBM)
            pl.BlockSpec((F, H), lambda i, ids_s: (0, 0)),       # w1 (resident)
            pl.BlockSpec((1, H), lambda i, ids_s: (0, 0)),       # b1 (resident)
            pl.BlockSpec((H, D_pad), lambda i, ids_s: (0, 0)),   # w2_proj (resident)
            pl.BlockSpec((1, D_pad), lambda i, ids_s: (0, 0)),   # b2_proj (resident)
        ],
        out_specs=pl.BlockSpec((TB, D_pad), lambda i, ids_s: (i, 0)),
        scratch_shapes=[
            pltpu.VMEM((TB, D_pad), jnp.float32),
            pltpu.SemaphoreType.DMA((TB,)),
        ],
    )

    out_padded = pl.pallas_call(
        item_embedding_kernel,
        out_shape=jax.ShapeDtypeStruct((B_pad, D_pad), jnp.float32),
        grid_spec=grid_spec,
        compiler_params=pltpu.CompilerParams(
            dimension_semantics=("parallel",)),
    )(ids, feats, table_proj, w1, b1.reshape(1, H), w2_proj, b2_proj)

    return out_padded[:B, :D]


@functools.partial(jax.jit, static_argnames=("batch_tile",))
def item_embedding_forward_ids_only(item_ids, table, wp, bp, *, batch_tile=128):
    """Features-absent path: out = Linear(D, D)(table[item_ids])."""
    B = item_ids.shape[0]
    V, D = table.shape

    table_proj = table @ wp                          # (V, D); padding row stays 0
    D_pad = ((D + 127) // 128) * 128
    pad_d = D_pad - D
    table_proj = jnp.pad(table_proj, ((0, 0), (0, pad_d)))
    bias = jnp.pad(bp, ((0, pad_d),)).reshape(1, D_pad)

    TB = min(batch_tile, ((B + 7) // 8) * 8)
    B_pad = ((B + TB - 1) // TB) * TB
    ids = jnp.clip(item_ids.astype(jnp.int32), 0, V - 1)
    ids = _pad_batch(ids, B_pad)

    grid = (B_pad // TB,)
    grid_spec = pltpu.PrefetchScalarGridSpec(
        num_scalar_prefetch=1,
        grid=grid,
        in_specs=[
            pl.BlockSpec(memory_space=pl.ANY),                   # projected table (HBM)
            pl.BlockSpec((1, D_pad), lambda i, ids_s: (0, 0)),   # bias (resident)
        ],
        out_specs=pl.BlockSpec((TB, D_pad), lambda i, ids_s: (i, 0)),
        scratch_shapes=[
            pltpu.VMEM((TB, D_pad), jnp.float32),
            pltpu.SemaphoreType.DMA((TB,)),
        ],
    )

    out_padded = pl.pallas_call(
        item_embedding_ids_only_kernel,
        out_shape=jax.ShapeDtypeStruct((B_pad, D_pad), jnp.float32),
        grid_spec=grid_spec,
        compiler_params=pltpu.CompilerParams(
            dimension_semantics=("parallel",)),
    )(ids, table_proj, bias)

    return out_padded[:B, :D]


# ----------------------------------------------------------------------------
# Pure-JAX references
# ----------------------------------------------------------------------------
def reference_forward(item_ids, table, item_features, w1, b1, w2, b2, wp, bp):
    id_emb = table[item_ids]
    h = jnp.maximum(item_features @ w1 + b1, 0.0)
    feat_emb = h @ w2 + b2
    emb = jnp.concatenate([id_emb, feat_emb], axis=-1)
    return emb @ wp + bp


def reference_forward_ids_only(item_ids, table, wp, bp):
    return table[item_ids] @ wp + bp


if __name__ == "__main__":
    # Module hyper-parameters (small, consistent with the forward pass).
    item_num = 100
    padding_idx = 0
    D = 32      # embedding_dim
    F = 16      # feature_dim
    H = 32      # feature_hidden_dim
    B = 8       # batch
    V = item_num + 1

    key = jax.random.PRNGKey(0)
    (k_tab, k_ids, k_feat, k_w1, k_b1, k_w2, k_b2,
     k_wp, k_bp, k_wp2, k_bp2) = jax.random.split(key, 11)

    # Deterministic synthetic parameters (shapes match the nn.Module's __init__).
    table = jax.random.normal(k_tab, (V, D), jnp.float32) * 0.02
    table = table.at[padding_idx].set(0.0)                 # nn.Embedding padding_idx row = 0
    w1 = jax.random.normal(k_w1, (F, H), jnp.float32) * 0.1     # Linear(F, H) weight^T
    b1 = jax.random.normal(k_b1, (H,), jnp.float32) * 0.1
    w2 = jax.random.normal(k_w2, (H, D), jnp.float32) * 0.1     # Linear(H, D) weight^T
    b2 = jax.random.normal(k_b2, (D,), jnp.float32) * 0.1
    wp = jax.random.normal(k_wp, (2 * D, D), jnp.float32) * 0.1  # Linear(2D, D) weight^T
    bp = jax.random.normal(k_bp, (D,), jnp.float32) * 0.1
    # Separate projection params for the feature_dim=None module configuration.
    wp_only = jax.random.normal(k_wp2, (D, D), jnp.float32) * 0.1  # Linear(D, D) weight^T
    bp_only = jax.random.normal(k_bp2, (D,), jnp.float32) * 0.1

    # Inputs.
    item_ids = jax.random.randint(k_ids, (B,), 0, V, jnp.int32)
    item_features = jax.random.normal(k_feat, (B, F), jnp.float32)

    # --- features-present path ---
    out = item_embedding_forward(item_ids, table, item_features,
                                 w1, b1, w2, b2, wp, bp)
    out = jax.block_until_ready(out)
    ref = reference_forward(item_ids, table, item_features, w1, b1, w2, b2, wp, bp)
    assert out.shape == (B, D)
    assert jnp.allclose(out, ref, atol=1e-4, rtol=1e-4), "mismatch vs reference (features)"

    # --- features-absent path ---
    out2 = item_embedding_forward_ids_only(item_ids, table, wp_only, bp_only)
    out2 = jax.block_until_ready(out2)
    ref2 = reference_forward_ids_only(item_ids, table, wp_only, bp_only)
    assert out2.shape == (B, D)
    assert jnp.allclose(out2, ref2, atol=1e-4, rtol=1e-4), "mismatch vs reference (ids only)"

    print("KERNEL_OK")
</pallas_src>

<mosaic_0001>
module attributes {stable_mosaic.version = 11 : i64} {
  func.func @item_embedding_kernel(%arg0: i32, %arg1: memref<8xi32, #tpu.memory_space<smem>>, %arg2: memref<8x16xf32, #tpu.memory_space<vmem>>, %arg3: memref<101x128xf32, #tpu.memory_space<any>>, %arg4: memref<16x32xf32, #tpu.memory_space<vmem>>, %arg5: memref<1x32xf32, #tpu.memory_space<vmem>>, %arg6: memref<32x128xf32, #tpu.memory_space<vmem>>, %arg7: memref<1x128xf32, #tpu.memory_space<vmem>>, %arg8: memref<8x128xf32, #tpu.memory_space<vmem>>, %arg9: memref<8x128xf32, #tpu.memory_space<vmem>>, %arg10: memref<8x!tpu.dma_semaphore, #tpu.memory_space<semaphore_mem>>) attributes {dimension_semantics = [#tpu.dimension_semantics<parallel>], iteration_bounds = array<i64: 1>, scalar_prefetch = 1 : i64, scratch_operands = 2 : i64, tpu.core_type = #tpu.core_type<tc>, window_params = [{transform_indices = @transform_0, window_bounds = array<i64: 8, 16>}, {}, {pipeline_mode = #tpu.pipeline_mode<synchronous>, transform_indices = @transform_2, window_bounds = array<i64: 16, 32>}, {pipeline_mode = #tpu.pipeline_mode<synchronous>, transform_indices = @transform_3, window_bounds = array<i64: 1, 32>}, {pipeline_mode = #tpu.pipeline_mode<synchronous>, transform_indices = @transform_4, window_bounds = array<i64: 32, 128>}, {pipeline_mode = #tpu.pipeline_mode<synchronous>, transform_indices = @transform_5, window_bounds = array<i64: 1, 128>}, {transform_indices = @transform_6, window_bounds = array<i64: 8, 128>}]} {
    %c8_i32 = arith.constant 8 : i32
    %0 = arith.muli %arg0, %c8_i32 : i32
    %c0_i32 = arith.constant 0 : i32
    %c8_i32_0 = arith.constant 8 : i32
    %1 = arith.addi %c0_i32, %c8_i32_0 : i32
    %c1_i32 = arith.constant 1 : i32
    scf.for %arg11 = %c0_i32 to %1 step %c1_i32  : i32 {
      %c1_i32_21 = arith.constant 1 : i32
      %19 = arith.muli %arg11, %c1_i32_21 : i32
      %c0_i32_22 = arith.constant 0 : i32
      %20 = arith.addi %c0_i32_22, %19 : i32
      %21 = arith.addi %0, %20 : i32
      %22 = arith.index_cast %21 : i32 to index
      %23 = memref.load %arg1[%22] : memref<8xi32, #tpu.memory_space<smem>>
      %c0_i32_23 = arith.constant 0 : i32
      %24 = tpu.memref_slice %arg3[%23, %c0_i32_23] : memref<101x128xf32, #tpu.memory_space<any>> -> memref<1x128xf32, #tpu.memory_space<any>>
      %c0_i32_24 = arith.constant 0 : i32
      %25 = tpu.memref_slice %arg9[%20, %c0_i32_24] : memref<8x128xf32, #tpu.memory_space<vmem>> -> memref<1x128xf32, #tpu.memory_space<vmem>>
      %26 = tpu.memref_slice %arg10[%20] : memref<8x!tpu.dma_semaphore, #tpu.memory_space<semaphore_mem>> -> memref<1x!tpu.dma_semaphore, #tpu.memory_space<semaphore_mem>>
      %27 = tpu.memref_squeeze %26 : memref<1x!tpu.dma_semaphore, #tpu.memory_space<semaphore_mem>> -> memref<!tpu.dma_semaphore, #tpu.memory_space<semaphore_mem>>
      tpu.enqueue_dma source(%24 : memref<1x128xf32, #tpu.memory_space<any>>) target(%25 : memref<1x128xf32, #tpu.memory_space<vmem>>) target_semaphore(%27 : memref<!tpu.dma_semaphore, #tpu.memory_space<semaphore_mem>>)
    }
    %c8_i32_1 = arith.constant 8 : i32
    %c0 = arith.constant 0 : index
    %c0_2 = arith.constant 0 : index
    %2 = vector.load %arg2[%c0, %c0_2] : memref<8x16xf32, #tpu.memory_space<vmem>>, vector<8x16xf32>
    %c0_3 = arith.constant 0 : index
    %c0_4 = arith.constant 0 : index
    %3 = vector.load %arg4[%c0_3, %c0_4] : memref<16x32xf32, #tpu.memory_space<vmem>>, vector<16x32xf32>
    %cst = arith.constant dense<0.000000e+00> : vector<8x32xf32>
    %4 = tpu.matmul %2, %3, %cst {dimension_numbers = #tpu.dot_dimension_numbers<[1], [0], [0], [1], [0, 0, 1, 1], [], []>} : vector<8x16xf32>, vector<16x32xf32>, vector<8x32xf32> -> vector<8x32xf32>
    %c0_5 = arith.constant 0 : index
    %c0_6 = arith.constant 0 : index
    %5 = vector.load %arg5[%c0_5, %c0_6] : memref<1x32xf32, #tpu.memory_space<vmem>>, vector<1x32xf32>
    %6 = vector.broadcast %5 : vector<1x32xf32> to vector<8x32xf32>
    %7 = arith.addf %4, %6 : vector<8x32xf32>
    %cst_7 = arith.constant 0.000000e+00 : f32
    %8 = vector.broadcast %cst_7 : f32 to vector<8x32xf32>
    %9 = arith.maximumf %7, %8 : vector<8x32xf32>
    %c0_8 = arith.constant 0 : index
    %c0_9 = arith.constant 0 : index
    %10 = vector.load %arg6[%c0_8, %c0_9] : memref<32x128xf32, #tpu.memory_space<vmem>>, vector<32x128xf32>
    %cst_10 = arith.constant dense<0.000000e+00> : vector<8x128xf32>
    %11 = tpu.matmul %9, %10, %cst_10 {dimension_numbers = #tpu.dot_dimension_numbers<[1], [0], [0], [1], [0, 0, 1, 1], [], []>} : vector<8x32xf32>, vector<32x128xf32>, vector<8x128xf32> -> vector<8x128xf32>
    %c0_11 = arith.constant 0 : index
    %c0_12 = arith.constant 0 : index
    %12 = vector.load %arg7[%c0_11, %c0_12] : memref<1x128xf32, #tpu.memory_space<vmem>>, vector<1x128xf32>
    %13 = vector.broadcast %12 : vector<1x128xf32> to vector<8x128xf32>
    %14 = arith.addf %11, %13 : vector<8x128xf32>
    %c0_i32_13 = arith.constant 0 : i32
    %c8_i32_14 = arith.constant 8 : i32
    %15 = arith.addi %c0_i32_13, %c8_i32_14 : i32
    %c1_i32_15 = arith.constant 1 : i32
    scf.for %arg11 = %c0_i32_13 to %15 step %c1_i32_15  : i32 {
      %c1_i32_21 = arith.constant 1 : i32
      %19 = arith.muli %arg11, %c1_i32_21 : i32
      %c0_i32_22 = arith.constant 0 : i32
      %20 = arith.addi %c0_i32_22, %19 : i32
      %c0_i32_23 = arith.constant 0 : i32
      %c0_i32_24 = arith.constant 0 : i32
      %21 = tpu.memref_slice %arg3[%c0_i32_23, %c0_i32_24] : memref<101x128xf32, #tpu.memory_space<any>> -> memref<1x128xf32, #tpu.memory_space<any>>
      %c0_i32_25 = arith.constant 0 : i32
      %22 = tpu.memref_slice %arg9[%20, %c0_i32_25] : memref<8x128xf32, #tpu.memory_space<vmem>> -> memref<1x128xf32, #tpu.memory_space<vmem>>
      %23 = tpu.memref_slice %arg10[%20] : memref<8x!tpu.dma_semaphore, #tpu.memory_space<semaphore_mem>> -> memref<1x!tpu.dma_semaphore, #tpu.memory_space<semaphore_mem>>
      %24 = tpu.memref_squeeze %23 : memref<1x!tpu.dma_semaphore, #tpu.memory_space<semaphore_mem>> -> memref<!tpu.dma_semaphore, #tpu.memory_space<semaphore_mem>>
      tpu.wait_dma2 semaphore(%24 : memref<!tpu.dma_semaphore, #tpu.memory_space<semaphore_mem>>) src(%21 : memref<1x128xf32, #tpu.memory_space<any>>) dst(%22 : memref<1x128xf32, #tpu.memory_space<vmem>>)
    }
    %c8_i32_16 = arith.constant 8 : i32
    %c0_17 = arith.constant 0 : index
    %c0_18 = arith.constant 0 : index
    %16 = vector.load %arg9[%c0_17, %c0_18] : memref<8x128xf32, #tpu.memory_space<vmem>>, vector<8x128xf32>
    %17 = arith.addf %16, %14 : vector<8x128xf32>
    %c0_19 = arith.constant 0 : index
    %c0_20 = arith.constant 0 : index
    %18 = vector.load %arg8[%c0_19, %c0_20] : memref<8x128xf32, #tpu.memory_space<vmem>>, vector<8x128xf32>
    tpu.vector_store %arg8[%c0_19, %c0_20], %17 {strides = array<i32>} : memref<8x128xf32, #tpu.memory_space<vmem>>, vector<8x128xf32>,
    return
  }
  func.func @transform_0(%arg0: i32, %arg1: memref<8xi32, #tpu.memory_space<smem>>) -> (i32, i32) {
    %c0_i32 = arith.constant 0 : i32
    %c0_i32_0 = arith.constant 0 : i32
    return %arg0, %c0_i32 : i32, i32
  }
  func.func @transform_2(%arg0: i32, %arg1: memref<8xi32, #tpu.memory_space<smem>>) -> (i32, i32) {
    %c0_i32 = arith.constant 0 : i32
    %c0_i32_0 = arith.constant 0 : i32
    %c0_i32_1 = arith.constant 0 : i32
    return %c0_i32, %c0_i32_0 : i32, i32
  }
  func.func @transform_3(%arg0: i32, %arg1: memref<8xi32, #tpu.memory_space<smem>>) -> (i32, i32) {
    %c0_i32 = arith.constant 0 : i32
    %c0_i32_0 = arith.constant 0 : i32
    %c0_i32_1 = arith.constant 0 : i32
    return %c0_i32, %c0_i32_0 : i32, i32
  }
  func.func @transform_4(%arg0: i32, %arg1: memref<8xi32, #tpu.memory_space<smem>>) -> (i32, i32) {
    %c0_i32 = arith.constant 0 : i32
    %c0_i32_0 = arith.constant 0 : i32
    %c0_i32_1 = arith.constant 0 : i32
    return %c0_i32, %c0_i32_0 : i32, i32
  }
  func.func @transform_5(%arg0: i32, %arg1: memref<8xi32, #tpu.memory_space<smem>>) -> (i32, i32) {
    %c0_i32 = arith.constant 0 : i32
    %c0_i32_0 = arith.constant 0 : i32
    %c0_i32_1 = arith.constant 0 : i32
    return %c0_i32, %c0_i32_0 : i32, i32
  }
  func.func @transform_6(%arg0: i32, %arg1: memref<8xi32, #tpu.memory_space<smem>>) -> (i32, i32) {
    %c0_i32 = arith.constant 0 : i32
    %c0_i32_0 = arith.constant 0 : i32
    return %arg0, %c0_i32 : i32, i32
  }
}

</mosaic_0001>

<bundles_post_ra>
// kernel: item_embedding_forward.1
= control target key start
LH: loop header
LB: loop body
LE: loop exit
PB: predicated region body
PF: predicated region fallthrough
CT: control target
= control target key end

     0   :  { %s555_s0 = inlined_call_operand.vmem [shape: s32[8], index: 0, kind: input, shape index: {}]   ;;  %s556_s1 = inlined_call_operand.vmem [shape: f32[8,16], index: 1, kind: input, shape index: {}]   ;;  %s557_s2 = inlined_call_operand.vmem [shape: f32[101,128], index: 2, kind: input, shape index: {}]   ;;  %s558_s3 = inlined_call_operand.vmem [shape: f32[16,32], index: 3, kind: input, shape index: {}]   ;;  %s559_s4 = inlined_call_operand.vmem [shape: f32[1,32], index: 4, kind: input, shape index: {}]   ;;  %s560_s5 = inlined_call_operand.vmem [shape: f32[32,128], index: 5, kind: input, shape index: {}]   ;;  %s561_s6 = inlined_call_operand.vmem [shape: f32[1,128], index: 6, kind: input, shape index: {}]   ;;  %s562_s7 = inlined_call_operand.hbm [shape: f32[8,128], index: 7, kind: output, shape index: {}]  }
   0x1   :  { %s12_s26 = sshll.u32 %s555_s0, 4  ;;  %s13_s26 = int_to_ptr.vmem [resolvable:$true] %s12_s26 }
   0x2   :  { %s421_s27 = scalar_lea.vmem %s13_s26, 16  ;;  %p426_p1 = scmp.lt.s32.totalorder %s13_s26, %s13_s26 }
   0x3   :  { %p422_p0 = scmp.ne.s32.totalorder %s13_s26, %s421_s27  ;;  %p427_p2 = scmp.lt.s32.totalorder %s421_s27, %s421_s27 }
   0x5   :  { %p428_p3 = por %p427_p2, %p426_p1 }
   0x7   :  { %p429_p4 = pnand %p428_p3, %p422_p0 }
   0x9   :  { %432 = shalt.err (!%p429_p4)  }
   0xa   :  { %s475_s28 = smov [#allocation5]  }
   0xb   :  { %15 = dma.vmem_to_smem %s13_s26, 16, %s475_s28, [#allocation4] }
   0xc   :  { %461 = dma.done.wait [#allocation4], 16 }
   0xd   :  { %462 = vsyncadd [#allocation4], 4294967280 }
   0xe   :  { %17 = sfence }
   0xf   :  { %18 = vsyncpa [#allocation7], 0  ;;  %s467_s29 = smov 0  }
  0x10 LB: > { %s37_s30 = sld [smem:[#allocation5 + %s469_s29]]  ;;  %s39_s10 = scalar_lea.vmem [#allocation2], %s469_s29  ;;  %s469_s29 = sphi %s467_s29, %s35_s29  }
  0x11   : > { %s40_s11 = scalar_lea.sflag [#allocation3], %s469_s29 }
  0x16   : > { %s38_s9 = scalar_lea.vmem %s557_s2, %s37_s30 }
  0x17   : > { %v59_v0 = vld [vmem:[%s38_s9] sm:$0x1] }
  0x18   : > { %60 = vst [vmem:[%s39_s10] sm:$0x1] %v59_v0 }
  0x19   : > { %86 = vsyncadd %s40_s11, 16  ;;  %s35_s29 = sadd.s32 1, %s469_s29  }
  0x1a   : > { %p32_p5 = scmp.ge.s32.totalorder %s35_s29, 8  }
  0x1b   :  { %v89_v1 = vld [vmem:[%s558_s3 + $0x8] sm:$0xff] (%p32_p5)  ;;  %v476_v2 = vmov (%p32_p5), 0.0   ;;  %v88_v3 = vld [vmem:[%s558_s3] sm:$0xff] (%p32_p5)  ;;  %vm477_vm0 = vmmov (%p32_p5), 0   ;;  %v175_v4 = vld [vmem:[%s560_s5 + $0x18] sm:$0xff] (%p32_p5)  ;;  %vm97_vm1 = vcmask (%p32_p5), 130048  }
  0x1c   :  { %34 = sbr.rel (!%p32_p5) target bundleno = 16 (0x10), region = 105  ;;  %383 = vmatprep.subr.mxu0 (%p32_p5), %v476_v2  ;;  %387 = vmatprep.mubr.msk.f32.mxu0 (%p32_p5), %vm477_vm0, %v476_v2  ;;  %v87_v5 = vld [vmem:[%s556_s1] sm:$0xff] (%p32_p5)  ;;  %v174_v6 = vld [vmem:[%s560_s5 + $0x10] sm:$0xff] (%p32_p5)  ;;  %v173_v7 = vld [vmem:[%s560_s5 + $0x8] sm:$0xff] (%p32_p5)  ;;  %vm183_vm2 = vcmask (%p32_p5), 261120   ;;  %s471_s27 = smov (%p32_p5), 0  }
  0x1d   :  { %384 = vmatpush3.msra.mxu0 (%p32_p5), %v89_v1  ;;  %390 = vmatprep.subr.mxu1 (%p32_p5), %v476_v2  ;;  %v172_v8 = vld [vmem:[%s560_s5] sm:$0xff] (%p32_p5) }
  0x1e   :  { %385 = vmatprep.subr.mxu0 (%p32_p5), %v476_v2  ;;  %391 = vmatpush3.msra.mxu1 (%p32_p5), %v175_v4  ;;  %v363_v9 = vld [vmem:[%s559_s4] ss:$0 sm:$0xff] (%p32_p5) }
  0x1f   :  { %386 = vmatpush3.msra.mxu0 (%p32_p5), %v88_v3  ;;  %392 = vmatprep.subr.mxu1 (%p32_p5), %v476_v2  ;;  %v365_v14 = vld [vmem:[%s561_s6] ss:$0 sm:$0xff] (%p32_p5) }
  0x20   :  { %388 = vmatmul.mubr.msk.f32.vlgmr.msra.gmra.mxu0 (%p32_p5), %vm97_vm1, %v87_v5  ;;  %398 = vmatprep.mubr.msk.f32.mxu1 (%p32_p5), %vm477_vm0, %v476_v2 }
  0x21   :  { %393 = vmatpush3.msra.mxu1 %v174_v6 }
  0x22   :  { %394 = vmatprep.subr.mxu1 %v476_v2 }
  0x23   :  { %395 = vmatpush3.msra.mxu1 %v173_v7 }
  0x24   :  { %396 = vmatprep.subr.mxu1 %v476_v2 }
  0x25   :  { %397 = vmatpush3.msra.mxu1 %v172_v8 }
  0xe0   :  { %v167_v10 = vpop.f32.mrf.mxu0 }
  0xe1   :  { %v168_v11 = vadd.f32 %v363_v9, %v167_v10 }
  0xe2   :  { %v389_v12 = vpop.f32.mrf.mxu0 }
  0xe3   :  { %v171_v13 = vmax.f32 %v168_v11, 0.0 }
  0xe5   :  { %399 = vmatmul.mubr.msk.f32.vlgmr.msra.gmra.mxu1 %vm183_vm2, %v171_v13 }
 0x1a5   :  { %v253_v15 = vpop.f32.mrf.mxu1 }
 0x1a6   :  { %v254_v16 = vadd.f32 %v365_v14, %v253_v15 }
 0x1a7   :  { %v400_v17 = vpop.f32.mrf.mxu1 }
 0x1a8 LB: > { %s263_s5 = scalar_lea.sflag [#allocation3], %s473_s27  ;;  %s473_s27 = sphi %s471_s27, %s262_s27  }
 0x1a9   : > { %463 = dma.done.wait %s263_s5, 16 }
 0x1aa   : > { %464 = vsyncadd %s263_s5, 4294967280  ;;  %s262_s27 = sadd.s32 1, %s473_s27  }
 0x1ab   : > { %p259_p6 = scmp.ge.s32.totalorder %s262_s27, 8  }
 0x1ac   :  { %v267_v18 = vld [vmem:[#allocation2] sm:$0xff] (%p259_p6)  ;;  %s478_s4 = smov (%p259_p6), [#allocation6]  }
 0x1ad   :  { %261 = sbr.rel (!%p259_p6) target bundleno = 424 (0x1a8), region = 116  ;;  %v268_v19 = vadd.f32 (%p259_p6), %v267_v18, %v254_v16  ;;  %s276_s28 = sshll.u32 (%p259_p6), %s478_s4, 4  ;;  %s277_s28 = int_to_ptr.vmem [resolvable:$true] %s276_s28 }
 0x1ae   :  { %s433_s6 = scalar_lea.vmem (%p259_p6), %s277_s28, 128  ;;  %p438_p8 = scmp.lt.s32.totalorder (%p259_p6), %s277_s28, %s277_s28 }
 0x1af   :  { %269 = vst [vmem:[#allocation6] sm:$0xff] (%p259_p6), %v268_v19  ;;  %p434_p7 = scmp.ne.s32.totalorder (%p259_p6), %s277_s28, %s433_s6  ;;  %p439_p9 = scmp.lt.s32.totalorder (%p259_p6), %s433_s6, %s433_s6 }
 0x1b1   :  { %p440_p10 = por (%p259_p6), %p439_p9, %p438_p8 }
 0x1b3   :  { %p441_p11 = pnand %p440_p10, %p434_p7 }
 0x1b5   :  { %444 = shalt.err (!%p441_p11)
}
 0x1b6   :  { %279 = dma.vmem_to_hbm [thread:$0]  %s277_s28, 128, %s562_s7, [#allocation7]  }
 0x1b7   :  { %465 = dma.done.wait [#allocation7], 128  }
 0x1b8   :  { %466 = vsyncadd [#allocation7], 4294967168 }
 0x1b9   :  { %283 = vsyncpa [#allocation7], 1 }
 0x1ba   :  { %284 = vsyncmov [#allocation3] }
 0x1bd   :  { %s285_s0 = vpop.sfrf %284 }
 0x1be   :  { %p367_p12 = scmp.ne.s32.totalorder %s285_s0, 0 }
 0x1c0   :  { %289 = shalt.err (%p367_p12)  }
 0x1c1   :  { %291 = vsyncmov [#allocation3 + $0x1] }
 0x1c4   :  { %s292_s8 = vpop.sfrf %291 }
 0x1c5   :  { %p368_p13 = scmp.ne.s32.totalorder %s292_s8, 0 }
 0x1c7   :  { %296 = shalt.err (%p368_p13)  }
 0x1c8   :  { %298 = vsyncmov [#allocation3 + $0x2] }
 0x1cb   :  { %s299_s9 = vpop.sfrf %298 }
 0x1cc   :  { %p369_p0 = scmp.ne.s32.totalorder %s299_s9, 0 }
 0x1ce   :  { %303 = shalt.err (%p369_p0)  }
 0x1cf   :  { %305 = vsyncmov [#allocation3 + $0x3] }
 0x1d2   :  { %s306_s10 = vpop.sfrf %305 }
 0x1d3   :  { %p370_p1 = scmp.ne.s32.totalorder %s306_s10, 0 }
 0x1d5   :  { %310 = shalt.err (%p370_p1)  }
 0x1d6   :  { %312 = vsyncmov [#allocation3 + $0x4] }
 0x1d9   :  { %s313_s7 = vpop.sfrf %312 }
 0x1da   :  { %p371_p2 = scmp.ne.s32.totalorder %s313_s7, 0 }
 0x1dc   :  { %317 = shalt.err (%p371_p2)  }
 0x1dd   :  { %319 = vsyncmov [#allocation3 + $0x5] }
 0x1e0   :  { %s320_s11 = vpop.sfrf %319 }
 0x1e1   :  { %p372_p3 = scmp.ne.s32.totalorder %s320_s11, 0 }
 0x1e3   :  { %324 = shalt.err (%p372_p3)  }
 0x1e4   :  { %326 = vsyncmov [#allocation3 + $0x6] }
 0x1e7   :  { %s327_s12 = vpop.sfrf %326 }
 0x1e8   :  { %p373_p4 = scmp.ne.s32.totalorder %s327_s12, 0 }
 0x1ea   :  { %331 = shalt.err (%p373_p4)  }
 0x1eb   :  { %333 = vsyncmov [#allocation3 + $0x7] }
 0x1ee   :  { %s334_s13 = vpop.sfrf %333 }
 0x1ef   :  { %p374_p5 = scmp.ne.s32.totalorder %s334_s13, 0 }
 0x1f1   :  { %338 = shalt.err (%p374_p5)  }

</bundles_post_ra>
